<compile_context>
chip_gen: v7x
topology: tpu7x:2x2x1
jax: 0.10.0
libtpu: 0.0.40
codegen_flags: <defaults>
</compile_context>

<pallas_src>
import functools

import jax
import jax.numpy as jnp
from jax.experimental import pallas as pl
from jax.experimental.pallas import tpu as pltpu


def attention_kernel(x_ref, wqkv_ref, wproj_ref, bproj_ref, o_ref, *,
                     batch_tile, seq_len, num_heads, scale, mxu_dtype):
    """One grid step = `batch_tile` batch elements, rows flattened to 2-D.

    x_ref    : (batch_tile * N, C)   VMEM
    wqkv_ref : (C, 3C)               VMEM   (qkv.weight^T, mxu_dtype)
    wproj_ref: (C, C)                VMEM   (proj.weight^T, mxu_dtype)
    bproj_ref: (1, C)                VMEM   (proj.bias, f32)
    o_ref    : (batch_tile * N, C)   VMEM
    """
    BT, N, H = batch_tile, seq_len, num_heads
    rows, C = x_ref.shape
    Dh = C // H
    BH = BT * H

    # ---- QKV projection: one big (rows, C) @ (C, 3C) MXU matmul ------------
    x = x_ref[...].astype(mxu_dtype)
    qkv = jnp.dot(x, wqkv_ref[...],
                  preferred_element_type=jnp.float32)          # (rows, 3C) f32

    # Fold the softmax scale into q (rows*C elements, not H*N*N scores).
    q2 = qkv[:, 0 * C:1 * C] * scale
    k2 = qkv[:, 1 * C:2 * C]
    v2 = qkv[:, 2 * C:3 * C]

    # Head-major (BT*H, N, Dh) layout: transposes in f32, casts elementwise,
    # dots get a single leading batch dim (clean MXU lowering).
    def to_heads(t2d):
        t = t2d.reshape(BT, N, H, Dh)
        return jnp.transpose(t, (0, 2, 1, 3)).reshape(BH, N, Dh)

    q = to_heads(q2).astype(mxu_dtype)
    k = to_heads(k2).astype(mxu_dtype)
    v = to_heads(v2).astype(mxu_dtype)

    # ---- scaled dot-product attention --------------------------------------
    s = jnp.einsum('bqd,bkd->bqk', q, k,
                   preferred_element_type=jnp.float32)          # (BH, N, N) f32

    # Numerically-stable softmax; statistics in f32, reciprocal on the EUP.
    s_max = jnp.max(s, axis=-1, keepdims=True)
    p = jnp.exp(s - s_max)
    p = p * pl.reciprocal(jnp.sum(p, axis=-1, keepdims=True), approx=True)

    ctx = jnp.einsum('bqk,bkd->bqd', p.astype(mxu_dtype), v,
                     preferred_element_type=jnp.float32)        # (BH, N, Dh) f32

    # Back to the flattened lane-dense (rows, C) slab.
    ctx = jnp.transpose(ctx.reshape(BT, H, N, Dh), (0, 2, 1, 3)).reshape(rows, C)

    # ---- output projection ---------------------------------------------------
    y = jnp.dot(ctx.astype(mxu_dtype), wproj_ref[...],
                preferred_element_type=jnp.float32) + bproj_ref[...]
    o_ref[...] = y.astype(o_ref.dtype)


def _pick_batch_tile(B, N, target_rows):
    """Batch elements per grid step: aim for ~target_rows MXU rows per step,
    keep >= 2 parallel blocks when B >= 2 (v7x has two TensorCores), and keep
    the block row count sublane(8)-aligned when possible."""
    divisors = [d for d in range(1, B + 1) if B % d == 0]
    aligned = [d for d in divisors if (d * N) % 8 == 0] or [B]
    cap = max(B // 2, 1)
    want = max(1, min(cap, -(-target_rows // N)))
    cands = [d for d in aligned if d <= want]
    return max(cands) if cands else min(aligned)


def attention_forward(x, w_qkv, w_proj, b_proj, *, num_heads,
                      mxu_dtype=jnp.bfloat16, target_rows=256):
    """x: (B, N, C); w_qkv: (3C, C); w_proj: (C, C); b_proj: (C,)."""
    B, N, C = x.shape
    assert C % num_heads == 0
    head_dim = C // num_heads
    scale = float(head_dim) ** -0.5

    BT = _pick_batch_tile(B, N, target_rows)
    rows = BT * N
    grid = (B // BT,)

    # Pre-transpose weights (kernel computes x @ W); cast MXU operands once.
    w_qkv_t = jnp.transpose(w_qkv).astype(mxu_dtype)      # (C, 3C)
    w_proj_t = jnp.transpose(w_proj).astype(mxu_dtype)    # (C, C)
    b_proj_2d = b_proj.reshape(1, C).astype(jnp.float32)  # (1, C)

    # Flatten batch*seq rows -> lane-dense 2-D slab.
    x2d = x.reshape(B * N, C)

    kernel = functools.partial(
        attention_kernel, batch_tile=BT, seq_len=N, num_heads=num_heads,
        scale=scale, mxu_dtype=mxu_dtype)

    # Advisory cost estimate for XLA scheduling around the custom call.
    flops = (2 * B * N * C * (3 * C)
             + 4 * B * num_heads * N * N * head_dim
             + 2 * B * N * C * C)
    w_bytes = jnp.dtype(mxu_dtype).itemsize
    cost = pl.CostEstimate(
        flops=flops,
        transcendentals=B * num_heads * N * N,
        bytes_accessed=(2 * B * N * C * x.dtype.itemsize
                        + (C * 3 * C + C * C) * w_bytes + 4 * C))

    # Per-block VMEM footprint (I/O blocks + weights + f32 intermediates) with
    # margin for double buffering / spills; never set below default scoped VMEM.
    block_bytes = (2 * rows * C * 4                       # x block + out block
                   + (C * 3 * C + C * C) * w_bytes        # weights
                   + rows * 3 * C * 4                     # qkv
                   + 2 * BT * num_heads * N * N * 4       # scores + probs
                   + 2 * rows * C * 4)                    # ctx + y
    vmem_limit = int(min(max(4 * block_bytes, 32 * 1024 * 1024),
                         64 * 1024 * 1024))

    out2d = pl.pallas_call(
        kernel,
        out_shape=jax.ShapeDtypeStruct((B * N, C), x.dtype),
        grid_spec=pltpu.PrefetchScalarGridSpec(
            num_scalar_prefetch=0,
            grid=grid,
            in_specs=[
                pl.BlockSpec((rows, C), lambda i: (i, 0)),      # x rows
                pl.BlockSpec((C, 3 * C), lambda i: (0, 0)),     # W_qkv^T
                pl.BlockSpec((C, C), lambda i: (0, 0)),         # W_proj^T
                pl.BlockSpec((1, C), lambda i: (0, 0)),         # b_proj
            ],
            out_specs=pl.BlockSpec((rows, C), lambda i: (i, 0)),
        ),
        compiler_params=pltpu.CompilerParams(
            dimension_semantics=("parallel",),
            vmem_limit_bytes=vmem_limit),
        cost_estimate=cost,
    )(x2d, w_qkv_t, w_proj_t, b_proj_2d)

    return out2d.reshape(B, N, C)


def attention_reference(x, w_qkv, w_proj, b_proj, *, num_heads):
    """Pure-JAX reference matching the PyTorch forward (eval mode)."""
    B, N, C = x.shape
    head_dim = C // num_heads
    scale = float(head_dim) ** -0.5

    qkv = jnp.einsum('bnc,oc->bno', x, w_qkv)                     # (B, N, 3C)
    qkv = qkv.reshape(B, N, 3, num_heads, head_dim)
    qkv = jnp.transpose(qkv, (2, 0, 3, 1, 4))                     # (3, B, H, N, Dh)
    q, k, v = qkv[0], qkv[1], qkv[2]

    attn = jnp.einsum('bhnd,bhmd->bhnm', q, k) * scale
    attn = jax.nn.softmax(attn, axis=-1)
    ctx = jnp.einsum('bhnm,bhmd->bhnd', attn, v)                  # (B, H, N, Dh)
    ctx = jnp.transpose(ctx, (0, 2, 1, 3)).reshape(B, N, C)
    return jnp.einsum('bnc,oc->bno', ctx, w_proj) + b_proj


if __name__ == "__main__":
    # Small shapes consistent with the module: dim=C=32, num_heads=4, seq N=8.
    B, N, C = 2, 8, 32
    num_heads = 4

    key = jax.random.PRNGKey(0)
    kx, kq, kp, kb = jax.random.split(key, 4)

    x = jax.random.normal(kx, (B, N, C), dtype=jnp.float32)

    # Deterministic parameter init (shapes match nn.Linear in the module):
    #   qkv:  Linear(C, 3C, bias=False) -> weight (3C, C)
    #   proj: Linear(C, C)              -> weight (C, C), bias (C,)
    bound = 1.0 / (C ** 0.5)
    w_qkv = jax.random.uniform(kq, (3 * C, C), jnp.float32, -bound, bound)
    w_proj = jax.random.uniform(kp, (C, C), jnp.float32, -bound, bound)
    b_proj = jax.random.uniform(kb, (C,), jnp.float32, -bound, bound)

    ref = attention_reference(x, w_qkv, w_proj, b_proj, num_heads=num_heads)

    # f32 MXU operands (v5e-friendly): only drift source is the EUP approx
    # reciprocal in the softmax denominator.
    out_f32 = jax.block_until_ready(
        attention_forward(x, w_qkv, w_proj, b_proj, num_heads=num_heads,
                          mxu_dtype=jnp.float32))
    assert out_f32.shape == (B, N, C)
    err_f32 = float(jnp.max(jnp.abs(out_f32 - ref)))
    assert err_f32 < 5e-3, f"f32 path max err {err_f32}"

    # bf16 MXU operands with f32 accumulation (v6e/v7x fast path).
    out_bf16 = jax.block_until_ready(
        attention_forward(x, w_qkv, w_proj, b_proj, num_heads=num_heads,
                          mxu_dtype=jnp.bfloat16))
    assert out_bf16.shape == (B, N, C)
    err_bf16 = float(jnp.max(jnp.abs(out_bf16 - ref)))
    assert err_bf16 < 5e-2, f"bf16 path max err {err_bf16}"

    print("KERNEL_OK")
</pallas_src>

<mosaic_0001>
module attributes {stable_mosaic.version = 11 : i64} {
  func.func @attention_kernel(%arg0: i32, %arg1: memref<8x32xf32, #tpu.memory_space<vmem>>, %arg2: memref<32x96xf32, #tpu.memory_space<vmem>>, %arg3: memref<32x32xf32, #tpu.memory_space<vmem>>, %arg4: memref<1x32xf32, #tpu.memory_space<vmem>>, %arg5: memref<8x32xf32, #tpu.memory_space<vmem>>) attributes {dimension_semantics = [#tpu.dimension_semantics<parallel>], iteration_bounds = array<i64: 2>, scalar_prefetch = 0 : i64, scratch_operands = 0 : i64, tpu.core_type = #tpu.core_type<tc>, window_params = [{transform_indices = @transform_0, window_bounds = array<i64: 8, 32>}, {pipeline_mode = #tpu.pipeline_mode<synchronous>, transform_indices = @transform_1, window_bounds = array<i64: 32, 96>}, {pipeline_mode = #tpu.pipeline_mode<synchronous>, transform_indices = @transform_2, window_bounds = array<i64: 32, 32>}, {pipeline_mode = #tpu.pipeline_mode<synchronous>, transform_indices = @transform_3, window_bounds = array<i64: 1, 32>}, {transform_indices = @transform_4, window_bounds = array<i64: 8, 32>}]} {
    %c0 = arith.constant 0 : index
    %c0_0 = arith.constant 0 : index
    %0 = vector.load %arg1[%c0, %c0_0] : memref<8x32xf32, #tpu.memory_space<vmem>>, vector<8x32xf32>
    %c0_1 = arith.constant 0 : index
    %c0_2 = arith.constant 0 : index
    %1 = vector.load %arg2[%c0_1, %c0_2] : memref<32x96xf32, #tpu.memory_space<vmem>>, vector<32x96xf32>
    %cst = arith.constant dense<0.000000e+00> : vector<8x96xf32>
    %2 = tpu.matmul %0, %1, %cst {dimension_numbers = #tpu.dot_dimension_numbers<[1], [0], [0], [1], [0, 0, 1, 1], [], []>} : vector<8x32xf32>, vector<32x96xf32>, vector<8x96xf32> -> vector<8x96xf32>
    %3 = vector.extract_strided_slice %2 {offsets = [0, 0], sizes = [8, 32], strides = [1, 1]} : vector<8x96xf32> to vector<8x32xf32>
    %cst_3 = arith.constant 0.353553385 : f32
    %4 = vector.broadcast %cst_3 : f32 to vector<8x32xf32>
    %5 = arith.mulf %3, %4 : vector<8x32xf32>
    %6 = vector.extract_strided_slice %2 {offsets = [0, 32], sizes = [8, 32], strides = [1, 1]} : vector<8x96xf32> to vector<8x32xf32>
    %7 = vector.extract_strided_slice %2 {offsets = [0, 64], sizes = [8, 32], strides = [1, 1]} : vector<8x96xf32> to vector<8x32xf32>
    %8 = vector.shape_cast %5 : vector<8x32xf32> to vector<1x8x4x8xf32>
    %9 = tpu.transpose %8, [0, 2, 1, 3] : vector<1x8x4x8xf32> -> vector<1x4x8x8xf32>
    %10 = vector.shape_cast %9 : vector<1x4x8x8xf32> to vector<4x8x8xf32>
    %11 = vector.shape_cast %6 : vector<8x32xf32> to vector<1x8x4x8xf32>
    %12 = tpu.transpose %11, [0, 2, 1, 3] : vector<1x8x4x8xf32> -> vector<1x4x8x8xf32>
    %13 = vector.shape_cast %12 : vector<1x4x8x8xf32> to vector<4x8x8xf32>
    %14 = vector.shape_cast %7 : vector<8x32xf32> to vector<1x8x4x8xf32>
    %15 = tpu.transpose %14, [0, 2, 1, 3] : vector<1x8x4x8xf32> -> vector<1x4x8x8xf32>
    %16 = vector.shape_cast %15 : vector<1x4x8x8xf32> to vector<4x8x8xf32>
    "tpu.trace_start"() <{level = 10 : i32, message = "bqd,bkd->bqk"}> : () -> ()
    %cst_4 = arith.constant dense<0.000000e+00> : vector<4x8x8xf32>
    %17 = tpu.matmul %10, %13, %cst_4 {dimension_numbers = #tpu.dot_dimension_numbers<[2], [2], [1], [1], [0, 0, 0, 1, 1, 1], [0], [0]>} : vector<4x8x8xf32>, vector<4x8x8xf32>, vector<4x8x8xf32> -> vector<4x8x8xf32>
    "tpu.trace_stop"() : () -> ()
    %cst_5 = arith.constant dense<0xFF800000> : vector<4x8xf32>
    %18 = vector.multi_reduction <maximumf>, %17, %cst_5 [2] : vector<4x8x8xf32> to vector<4x8xf32>
    %19 = vector.shape_cast %18 : vector<4x8xf32> to vector<4x8x1xf32>
    %20 = vector.broadcast %19 : vector<4x8x1xf32> to vector<4x8x8xf32>
    %21 = arith.subf %17, %20 : vector<4x8x8xf32>
    %22 = math.exp %21 : vector<4x8x8xf32>
    %cst_6 = arith.constant dense<0.000000e+00> : vector<4x8xf32>
    %23 = vector.multi_reduction <add>, %22, %cst_6 [2] : vector<4x8x8xf32> to vector<4x8xf32>
    %24 = vector.shape_cast %23 : vector<4x8xf32> to vector<4x8x1xf32>
    %25 = tpu.reciprocal %24 {approx = true} : vector<4x8x1xf32> -> vector<4x8x1xf32>
    %26 = vector.broadcast %25 : vector<4x8x1xf32> to vector<4x8x8xf32>
    %27 = arith.mulf %22, %26 : vector<4x8x8xf32>
    "tpu.trace_start"() <{level = 10 : i32, message = "bqk,bkd->bqd"}> : () -> ()
    %cst_7 = arith.constant dense<0.000000e+00> : vector<4x8x8xf32>
    %28 = tpu.matmul %27, %16, %cst_7 {dimension_numbers = #tpu.dot_dimension_numbers<[2], [1], [1], [2], [0, 0, 0, 1, 1, 2], [0], [0]>} : vector<4x8x8xf32>, vector<4x8x8xf32>, vector<4x8x8xf32> -> vector<4x8x8xf32>
    "tpu.trace_stop"() : () -> ()
    %29 = vector.shape_cast %28 : vector<4x8x8xf32> to vector<1x4x8x8xf32>
    %30 = tpu.transpose %29, [0, 2, 1, 3] : vector<1x4x8x8xf32> -> vector<1x8x4x8xf32>
    %31 = vector.shape_cast %30 : vector<1x8x4x8xf32> to vector<8x32xf32>
    %c0_8 = arith.constant 0 : index
    %c0_9 = arith.constant 0 : index
    %32 = vector.load %arg3[%c0_8, %c0_9] : memref<32x32xf32, #tpu.memory_space<vmem>>, vector<32x32xf32>
    %cst_10 = arith.constant dense<0.000000e+00> : vector<8x32xf32>
    %33 = tpu.matmul %31, %32, %cst_10 {dimension_numbers = #tpu.dot_dimension_numbers<[1], [0], [0], [1], [0, 0, 1, 1], [], []>} : vector<8x32xf32>, vector<32x32xf32>, vector<8x32xf32> -> vector<8x32xf32>
    %c0_11 = arith.constant 0 : index
    %c0_12 = arith.constant 0 : index
    %34 = vector.load %arg4[%c0_11, %c0_12] : memref<1x32xf32, #tpu.memory_space<vmem>>, vector<1x32xf32>
    %35 = vector.broadcast %34 : vector<1x32xf32> to vector<8x32xf32>
    %36 = arith.addf %33, %35 : vector<8x32xf32>
    %c0_13 = arith.constant 0 : index
    %c0_14 = arith.constant 0 : index
    %37 = vector.load %arg5[%c0_13, %c0_14] : memref<8x32xf32, #tpu.memory_space<vmem>>, vector<8x32xf32>
    tpu.vector_store %arg5[%c0_13, %c0_14], %36 {strides = array<i32>} : memref<8x32xf32, #tpu.memory_space<vmem>>, vector<8x32xf32>,
    return
  }
  func.func @transform_0(%arg0: i32) -> (i32, i32) {
    %c0_i32 = arith.constant 0 : i32
    %c0_i32_0 = arith.constant 0 : i32
    return %arg0, %c0_i32 : i32, i32
  }
  func.func @transform_1(%arg0: i32) -> (i32, i32) {
    %c0_i32 = arith.constant 0 : i32
    %c0_i32_0 = arith.constant 0 : i32
    %c0_i32_1 = arith.constant 0 : i32
    return %c0_i32, %c0_i32_0 : i32, i32
  }
  func.func @transform_2(%arg0: i32) -> (i32, i32) {
    %c0_i32 = arith.constant 0 : i32
    %c0_i32_0 = arith.constant 0 : i32
    %c0_i32_1 = arith.constant 0 : i32
    return %c0_i32, %c0_i32_0 : i32, i32
  }
  func.func @transform_3(%arg0: i32) -> (i32, i32) {
    %c0_i32 = arith.constant 0 : i32
    %c0_i32_0 = arith.constant 0 : i32
    %c0_i32_1 = arith.constant 0 : i32
    return %c0_i32, %c0_i32_0 : i32, i32
  }
  func.func @transform_4(%arg0: i32) -> (i32, i32) {
    %c0_i32 = arith.constant 0 : i32
    %c0_i32_0 = arith.constant 0 : i32
    return %arg0, %c0_i32 : i32, i32
  }
}

</mosaic_0001>

<bundles_post_ra>
// kernel: tpu_custom_call.1
= control target key start
LH: loop header
LB: loop body
LE: loop exit
PB: predicated region body
PF: predicated region fallthrough
CT: control target
= control target key end

     0   :  { %9 = vsyncpa [#allocation3], 0  ;;  %s2592_s0 = inlined_call_operand.hbm [shape: f32[16,32], index: 0, kind: input, shape index: {}]   ;;  %s2593_s1 = inlined_call_operand.hbm [shape: f32[32,96], index: 1, kind: input, shape index: {}]   ;;  %s2594_s2 = inlined_call_operand.hbm [shape: f32[32,32], index: 2, kind: input, shape index: {}]   ;;  %s2595_s3 = inlined_call_operand.vmem [shape: f32[1,32], index: 3, kind: input, shape index: {}]   ;;  %s2596_s4 = inlined_call_operand.hbm [shape: f32[16,32], index: 4, kind: output, shape index: {}]  }
   0x1   :  { %11 = vsyncpa [#allocation3 + $0x1], 0 }
   0x2   :  { %12 = vsyncpa [#allocation6], 0 }
   0x3   :  { %13 = vsyncpa [#allocation4], 0 }
   0x4   :  { %15 = vsyncpa [#allocation4 + $0x1], 0  ;;  %s2192_s15 = smov 0   ;;  %s2194_s16 = smov 0  }
   0x5   :  { %s2196_s17 = smov 0   ;;  %s2198_s18 = smov 0  }
   0x6 LB: > { %s2213_s19 = sadd.s32 4294967295, %s2146_s18   ;;  %s1753_s20 = sadd.s32 4294967294, %s2146_s18   ;;  %s2146_s18 = sphi %s2198_s18, %s2616_s18   ;;  %s2142_s17 = sphi %s2196_s17, %s2615_s17   ;;  %s2138_s16 = sphi %s2194_s16, %s2614_s16   ;;  %s2134_s15 = sphi %s2192_s15, %s2613_s15  }
   0x7   : > { %p41_p0 = scmp.ne.s32.totalorder %s2138_s16, %s2134_s15  ;;  %p2597_p1 = scmp.eq.s32.totalorder %s2213_s19, 0 }
   0x8   : > { %p134_p3 = scmp.eq.s32.totalorder %s1753_s20, 1  ;;  %p1754_p5 = scmp.ge.s32.totalorder %s2146_s18, 1 }
   0x9   : > { %p2222_p4 = por %p2597_p1, %p41_p0  ;;  %p141_p7 = scmp.lt.s32.totalorder %s2146_s18, 3 }
   0xa   : > { %p2227_p6 = por %p134_p3, %p41_p0  ;;  %s2148_s24 = smov [#allocation5]  }
   0xb   : > { %s2600_s21 = scalar_select %p2222_p4, 1, 0 }
   0xc   : > { %s2601_s22 = scalar_select %p2227_p6, 1, 0 }
   0xd   : > { %p2232_p8 = pnand %p1754_p5, %p141_p7  ;;  %s153_s25 = sshll.u32 %s2148_s24, 4  ;;  %s2236_s25 = int_to_ptr.vmem [resolvable:$true] %s153_s25 }
   0xe   : > { %s2149_s27 = smov [#allocation7]   ;;  %s1990_s5 = scalar_lea.hbm %s2593_s1, 512 }
   0xf   : > { %p1904_p9 = pneg %p2232_p8  ;;  %s166_s28 = sshll.u32 %s2149_s27, 4  ;;  %s2247_s28 = int_to_ptr.vmem [resolvable:$true] %s166_s28 }
  0x10   : > { %p1991_p12 = scmp.ne.s32.totalorder %s2593_s1, %s1990_s5  ;;  %p1997_p5 = scmp.lt.u32.totalorder %s1990_s5, %s2593_s1 }
  0x11   : > { %p2243_p11 = pnand %p1904_p9, %p2597_p1 }
  0x13   : > { %p1992_p13 = pneg %p2243_p11 }
  0x15   : > { %p1993_p0 = pnand %p1992_p13, %p1991_p12 }
  0x17   : > { %p1994_p3 = pneg %p1993_p0 }
  0x19   : > { %p1999_p7 = pnand %p1997_p5, %p1994_p3 }
  0x1b   : > { %2002 = shalt.err (!%p1999_p7)
}
  0x1c   : > { %s2003_s10 = scalar_lea.vmem %s2236_s25, 512  ;;  %p2011_p2 = scmp.lt.s32.totalorder %s2236_s25, %s2236_s25 }
  0x1d   : > { %p2004_p9 = scmp.ne.s32.totalorder %s2236_s25, %s2003_s10  ;;  %p2012_p12 = scmp.lt.s32.totalorder %s2003_s10, %s2003_s10 }
  0x1f   : > { %p2006_p10 = pnand %p2004_p9, %p1992_p13  ;;  %p2013_p0 = por %p2012_p12, %p2011_p2 }
  0x21   : > { %p2007_p1 = pneg %p2006_p10 }
  0x23   : > { %p2014_p6 = pnand %p2013_p0, %p2007_p1 }
  0x25   : > { %2017 = shalt.err (!%p2014_p6)
}
  0x26   : > { %s2150_s11 = smov 128   ;;  %s2151_s12 = smov 8  }
  0x27   : > { %1907 = dma.hbm_to_vmem [thread:$0]  (!%p2243_p11), %s2593_s1, 512, %s2236_s25, [#allocation6], %s2150_s11, %s2150_s11, %s2151_s12  }
  0x28   : > { %s2018_s27 = scalar_lea.hbm %s2594_s2, 512 }
  0x29   : > { %p2019_p2 = scmp.ne.s32.totalorder %s2594_s2, %s2018_s27  ;;  %p2025_p10 = scmp.lt.u32.totalorder %s2018_s27, %s2594_s2 }
  0x2b   : > { %p2021_p1 = pnand %p2019_p2, %p1992_p13 }
  0x2d   : > { %p2022_p6 = pneg %p2021_p1 }
  0x2f   : > { %p2027_p3 = pnand %p2025_p10, %p2022_p6 }
  0x31   : > { %2030 = shalt.err (!%p2027_p3)
}
  0x32   : > { %s2031_s25 = scalar_lea.vmem %s2247_s28, 512  ;;  %p2039_p12 = scmp.lt.s32.totalorder %s2247_s28, %s2247_s28 }
  0x33   : > { %p2032_p5 = scmp.ne.s32.totalorder %s2247_s28, %s2031_s25  ;;  %p2040_p0 = scmp.lt.s32.totalorder %s2031_s25, %s2031_s25 }
  0x35   : > { %p2034_p7 = pnand %p2032_p5, %p1992_p13  ;;  %p2041_p2 = por %p2040_p0, %p2039_p12 }
  0x37   : > { %p2035_p9 = pneg %p2034_p7 }
  0x39   : > { %p2042_p1 = pnand %p2041_p2, %p2035_p9 }
  0x3b   : > { %2045 = shalt.err (!%p2042_p1)
}
  0x3c   : > { %1910 = dma.hbm_to_vmem [thread:$0]  (!%p2243_p11), %s2594_s2, 512, %s2247_s28, [#allocation6], %s2150_s11, %s2150_s11, %s2151_s12  }
  0x3d   : > { %s2302_s9 = sadd.s32 1, %s2146_s18   ;;  %s28_s26 = sadd.s32 1, %s2142_s17 }
  0x3e   : > { %s25_s10 = ssub.s32 %s2146_s18, %s2302_s9  ;;  %p35_p13 = scmp.ne.s32.totalorder %s2142_s17, %s2138_s16 }
  0x3f   : > { %p26_p6 = scmp.eq.s32.totalorder %s25_s10, 0  ;;  %p36_p10 = scmp.eq.s32.totalorder %s2146_s18, 0 }
  0x40   : > { %p2604_p3 = scmp.eq.s32.totalorder %s2213_s19, 1  ;;  %p1921_p7 = scmp.lt.s32.totalorder %s2146_s18, 2 }
  0x41   : > { %s2318_s14 = scalar_select %p26_p6, %s2142_s17, %s28_s26  }
  0x42   : > { %p2312_p5 = por %p2604_p3, %p35_p13  ;;  %p37_p9 = por %p36_p10, %p35_p13 }
  0x43   : > { %s183_s20 = sand.u32 1, %s2142_s17   ;;  %s1759_s28 = sshll.u32 %s2146_s18, 7 }
  0x44   : > { %s2605_s13 = scalar_select %p2312_p5, 1, 0 }
  0x45   : > { %s1758_s24 = sshll.u32 %s183_s20, 3  ;;  %s2325_s27 = scalar_lea.hbm %s2592_s0, %s1759_s28 }
  0x46   : > { %s187_s29 = scalar_lea.vmem [#allocation2], %s1758_s24  ;;  %p2329_p11 = pnand %p1921_p7, %p37_p9 }
  0x47   : > { %s194_s30 = sshll.u32 %s187_s29, 4  ;;  %s184_s6 = scalar_lea.sflag [#allocation3], %s183_s20  ;;  %s2327_s30 = int_to_ptr.vmem [resolvable:$true] %s194_s30 }
  0x48   : > { %s2046_s25 = scalar_lea.hbm %s2325_s27, 128  ;;  %p2048_p0 = pneg %p2329_p11 }
  0x49   : > { %p2047_p12 = scmp.ne.s32.totalorder %s2325_s27, %s2046_s25  ;;  %s2051_s26 = scalar_lea.hbm %s2592_s0, 256 }
  0x4a   : > { %p2052_p13 = scmp.lt.u32.totalorder %s2325_s27, %s2592_s0  ;;  %p2053_p6 = scmp.lt.u32.totalorder %s2051_s26, %s2046_s25 }
  0x4b   : > { %p2049_p2 = pnand %p2048_p0, %p2047_p12  ;;  %p2055_p3 = scmp.lt.u32.totalorder %s2046_s25, %s2325_s27 }
  0x4c   : > { %p2054_p10 = por %p2053_p6, %p2052_p13 }
  0x4d   : > { %p2050_p1 = pneg %p2049_p2 }
  0x4e   : > { %p2056_p7 = por %p2055_p3, %p2054_p10 }
  0x50   : > { %p2057_p9 = pnand %p2056_p7, %p2050_p1 }
  0x52   : > { %2060 = shalt.err (!%p2057_p9)
}
  0x53   : > { %s2061_s20 = scalar_lea.vmem %s2327_s30, 128  ;;  %s2152_s28 = smov [#allocation2]  }
  0x54   : > { %p2062_p12 = scmp.ne.s32.totalorder %s2327_s30, %s2061_s20  ;;  %s2066_s11 = sshll.u32 %s2152_s28, 4  ;;  %s2067_s11 = int_to_ptr.vmem [resolvable:$false] %s2066_s11 }
  0x55   : > { %s2068_s12 = scalar_lea.vmem %s2067_s11, 256  ;;  %p2069_p4 = scmp.lt.s32.totalorder %s2327_s30, %s2067_s11 }
  0x56   : > { %p2064_p2 = pnand %p2062_p12, %p2048_p0  ;;  %p2070_p13 = scmp.lt.s32.totalorder %s2068_s12, %s2061_s20 }
  0x58   : > { %p2065_p5 = pneg %p2064_p2  ;;  %p2071_p6 = por %p2070_p13, %p2069_p4 }
  0x5a   : > { %p2072_p10 = pnand %p2071_p6, %p2065_p5 }
  0x5c   : > { %2075 = shalt.err (!%p2072_p10)
}
  0x5d   : > { %1914 = dma.hbm_to_vmem [thread:$0]  (!%p2329_p11), %s2325_s27, 128, %s2327_s30, %s184_s6  }
  0x5e   : > { %203 = sbr.rel (%p2232_p8) target bundleno = 1714 (0x6b2), region = 36  ;;  %s2361_s29 = sand.u32 (!%p2232_p8), 1, %s2138_s16  }
  0x5f   : > { %s1761_s25 = sshll.u32 (!%p2232_p8), %s2361_s29, 3  ;;  %s206_s7 = scalar_lea.sflag (!%p2232_p8), [#allocation3], %s2361_s29 }
  0x60   : > { %s209_s8 = scalar_lea.vmem (!%p2232_p8), [#allocation2], %s1761_s25  ;;  %p2607_p4 = scmp.ne.s32.totalorder (!%p2232_p8), %s2600_s21, 0 }
  0x65   : > { %2121 = dma.done.wait (%p2607_p4), %s206_s7, 128  }
  0x66   : > { %2123 = vsyncadd (%p2607_p4), %s206_s7, 4294967168  ;;  %p2608_p5 = scmp.eq.s32.totalorder %s2213_s19, 0 }
  0x68   : > { %2125 = dma.done.wait (%p2608_p5), [#allocation6], 1024   ;;  %p2609_p8 = pmov %p2608_p5 }
  0x69   : > { %v2153_v0 = vmov 0.0|0.0   ;;  %vm2154_vm0 = vmmov 0   ;;  %v2155_v1 = vmov 0.0   ;;  %v243_v2 = vld [vmem:[#allocation5] sm:$0xff]  ;;  %v244_v3 = vld [vmem:[#allocation5 + $0x8] sm:$0xff]  ;;  %v245_v4 = vld [vmem:[#allocation5 + $0x10] sm:$0xff]  ;;  %v337_v18 = vlaneseq }
  0x6a   : > { %2127 = vsyncadd (%p2609_p8), [#allocation6], 4294966272  ;;  %1880 = vmatprep.subr.bf16.mxu0 %v2153_v0  ;;  %1826 = vmatprep.mubr.msk.f32.mxu0 %vm2154_vm0, %v2155_v1  ;;  %v1881_v5 = vpack.c.bf16 %v244_v3, %v243_v2  ;;  %v246_v6 = vld [vmem:[#allocation5 + $0x18] sm:$0xff]  ;;  %vm247_vm1 = vcmask 261120   ;;  %s2156_s21 = smov 104   ;;  %s2157_s23 = smov 120  }
  0x6b   : > { %1829 = vmatprep.subr.mxu1 %v2155_v1  ;;  %1831 = vmatprep.mubr.msk.f32.mxu1 %vm2154_vm0, %v2155_v1  ;;  %v1884_v7 = vpack.c.bf16 %v246_v6, %v245_v4  ;;  %v242_v8 = vld [vmem:[%s209_s8] sm:$0xff]  ;;  %s2158_s27 = smov 96   ;;  %s2159_s30 = smov 112   ;;  %v2160_v16 = vmov 1983009808   ;;  %v338_v22 = vshrl.u32 %v337_v18, 7 }
  0x6c   : > { %1882 = vmatpush3.bf16.msra.mxu0 %v1881_v5  ;;  %v335_v17 = vunpack.c.l.s4 %v2160_v16  ;;  %v2161_v19 = vmov 1934713408   ;;  %vm771_vm2 = vcmask 64512   ;;  %s2162_s5 = smov 64   ;;  %s2163_s6 = smov 16   ;;  %vm1561_vm3 = vcmask 130048  }
  0x6d   : > { %1883 = vmatprep.subr.bf16.mxu0 %v2153_v0  ;;  %v367_v20 = vunpack.c.l.s4 %v2161_v19  ;;  %s2164_s26 = smov 8   ;;  %s2165_s10 = smov 24   ;;  %vm1563_vm4 = vcmask 195584  }
  0x6e   : > { %v336_v21 = vunpack.c.0.s8 %v335_v17  ;;  %s1789_s28 = sshll.u32 %s2213_s19, 7  ;;  %s241_s11 = scalar_lea.vmem [#allocation8], %s1761_s25 }
  0x6f   : > { %v368_v25 = vunpack.c.0.s8 %v367_v20  ;;  %s1664_s12 = sshll.u32 %s241_s11, 4  ;;  %p2610_p0 = scmp.ne.s32.totalorder %s2605_s13, 0  ;;  %s2549_s12 = int_to_ptr.vmem [resolvable:$true] %s1664_s12 }
  0x70   : > { %1885 = vmatpush3.bf16.msra.mxu0 %v1884_v7  ;;  %v2402_v26 = vsub.s32 %v336_v21, %v338_v22  ;;  %s2076_s19 = scalar_lea.vmem %s2549_s12, 128  ;;  %s2166_s25 = smov [#allocation8]  }
  0x71   : > { %1849 = vmatprep.subr.mxu0 %v2155_v1  ;;  %v2404_v33 = vsub.s32 %v368_v25, %v338_v22  ;;  %p2077_p11 = scmp.ne.s32.totalorder %s2549_s12, %s2076_s19 }
  0x73   : > { %1827 = vmatmul.mubr.msk.f32.vlgmr.msra.gmra.mrb[0].mxu0 %vm247_vm1, %v242_v8  ;;  %p2078_p1 = pnand %p2077_p11, %p2610_p0 }
  0x74   : > { %1851 = vmatprep.mubr.msk.f32.mxu0 %vm2154_vm0, %v2155_v1 }
  0x75   : > { %p2079_p3 = pneg %p2078_p1 }
 0x146   : > { %v2386_v9 = vpop.f32.mrb[0].mxu0 }
 0x147   : > { %473 = vrot.lane.b32.xlu1 %v2386_v9, %s2156_s21  ;;  %469 = vrot.lane.b32.xlu0 %v2386_v9, %s2157_s23  ;;  %v1828_v10 = vpop.f32.mrb[1].mxu0  ;;  %v321_v11 = vmul.f32 0.35355338, %v2386_v9 }
 0x14b   : > { %475 = vrot.lane.b32.xlu1 %v2386_v9, %s2158_s27  ;;  %471 = vrot.lane.b32.xlu0 %v2386_v9, %s2159_s30 }
 0x14f   : > { %323 = vrot.lane.b32.xlu1 %v321_v11, %s2157_s23  ;;  %s1651_s23 = scalar_lea.sflag [#allocation4], %s2361_s29 }
 0x1b9   : > { %v2393_v12 = vpop.permute.xlu0 %469  ;;  %v2396_v13 = vpop.permute.xlu1 %473 }
 0x1ba   : > { %477 = vrot.lane.b32.xlu0 %v2393_v12, %s2158_s27 }
 0x1bd   : > { %v2398_v14 = vpop.permute.xlu0 %471  ;;  %v476_v15 = vpop.permute.xlu1 %475 }
 0x1be   : > { %481 = vrot.lane.b32.xlu0 %v2396_v13, %s2158_s27  ;;  %479 = vrot.lane.b32.xlu1 %v2398_v14, %s2158_s27  ;;  %s2080_s27 = sshll.u32 %s2166_s25, 4  ;;  %s2081_s27 = int_to_ptr.vmem [resolvable:$false] %s2080_s27 }
 0x1bf   : > { %p2083_p7 = scmp.lt.s32.totalorder %s2549_s12, %s2081_s27 }
 0x1c1   : > { %v324_v23 = vpop.permute.xlu1 %323 }
 0x1c2   : > { %326 = vrot.lane.b32.xlu0 %v321_v11, %s2159_s30  ;;  %329 = vrot.lane.b32.xlu1 %v321_v11, %s2156_s21  ;;  %s2547_s21 = scalar_lea.hbm %s2596_s4, %s1789_s28  ;;  %s2082_s30 = scalar_lea.vmem %s2081_s27, 256 }
 0x1c3   : > { %p2084_p9 = scmp.lt.s32.totalorder %s2082_s30, %s2076_s19 }
 0x1c5   : > { %p2085_p12 = por %p2084_p9, %p2083_p7 }
 0x1c7   : > { %p2086_p2 = pnand %p2085_p12, %p2079_p3 }
 0x22c   : > { %v478_v24 = vpop.permute.xlu0 %477 }
 0x230   : > { %v482_v27 = vpop.permute.xlu0 %481  ;;  %v480_v28 = vpop.permute.xlu1 %479 }
 0x231   : > { %v503_v29 = vcombine.low %v478_v24, %v482_v27  ;;  %v504_v30 = vcombine.high %v478_v24, %v482_v27  ;;  %v487_v31 = vcombine.low %v476_v15, %v480_v28  ;;  %v488_v32 = vcombine.high %v476_v15, %v480_v28 }
 0x233   : > { %v511_v34 = vrot.slane %v503_v29, %v2402_v26  ;;  %v518_v35 = vrot.slane %v504_v30, %v2402_v26  ;;  %v495_v36 = vrot.slane %v487_v31, %v2402_v26  ;;  %v502_v37 = vrot.slane %v488_v32, %v2402_v26 }
 0x234   : > { %v327_v38 = vpop.permute.xlu0 %326  ;;  %v330_v39 = vpop.permute.xlu1 %329 }
 0x235   : > { %v519_v40 = vcombine.low %v495_v36, %v511_v34  ;;  %v520_v41 = vcombine.high %v495_v36, %v511_v34  ;;  %v535_v42 = vcombine.low %v502_v37, %v518_v35  ;;  %v536_v43 = vcombine.high %v502_v37, %v518_v35 }
 0x236   : > { %v332_v44 = vcombine.low %v321_v11, %v327_v38  ;;  %v333_v45 = vcombine.high %v321_v11, %v327_v38  ;;  %v348_v46 = vcombine.low %v324_v23, %v330_v39  ;;  %v349_v47 = vcombine.high %v324_v23, %v330_v39 }
 0x237   : > { %v527_v48 = vrot.slane %v519_v40, %v2404_v33  ;;  %v534_v49 = vrot.slane %v520_v41, %v2404_v33  ;;  %v543_v50 = vrot.slane %v535_v42, %v2404_v33  ;;  %v550_v51 = vrot.slane %v536_v43, %v2404_v33 }
 0x238   : > { %v340_v52 = vrot.slane %v332_v44, %v2402_v26  ;;  %v347_v53 = vrot.slane %v333_v45, %v2402_v26  ;;  %v356_v54 = vrot.slane %v348_v46, %v2402_v26  ;;  %v363_v55 = vrot.slane %v349_v47, %v2402_v26 }
 0x239   : > { %v555_v56 = vcombine.low %v527_v48, %v534_v49  ;;  %v1768_v57 = vcombine.high %v527_v48, %v534_v49  ;;  %v571_v58 = vcombine.low %v543_v50, %v550_v51  ;;  %v1769_v59 = vcombine.high %v543_v50, %v550_v51 }
 0x23a   : > { %v364_v60 = vcombine.low %v340_v52, %v356_v54  ;;  %v365_v61 = vcombine.high %v340_v52, %v356_v54  ;;  %v380_v62 = vcombine.low %v347_v53, %v363_v55  ;;  %v381_v63 = vcombine.high %v347_v53, %v363_v55 }
 0x23b   : > { %v562_v2 = vrot.slane %v555_v56, %v2402_v26  ;;  %v570_v3 = vrot.slane %v1768_v57, %v2402_v26  ;;  %v578_v4 = vrot.slane %v571_v58, %v2402_v26  ;;  %v586_v5 = vrot.slane %v1769_v59, %v2402_v26 }
 0x23c   : > { %v372_v6 = vrot.slane %v364_v60, %v2404_v33  ;;  %v379_v7 = vrot.slane %v365_v61, %v2404_v33  ;;  %v388_v8 = vrot.slane %v380_v62, %v2404_v33  ;;  %v395_v10 = vrot.slane %v381_v63, %v2404_v33 }
 0x23d   : > { %v587_v11 = vcombine.low %v562_v2, %v570_v3  ;;  %v603_v15 = vcombine.low %v578_v4, %v586_v5  ;;  %v588_v30 = vcombine.high %v562_v2, %v570_v3  ;;  %v604_v31 = vcombine.high %v578_v4, %v586_v5 }
 0x23e   : > { %v400_v16 = vcombine.low %v372_v6, %v379_v7  ;;  %v1766_v17 = vcombine.high %v372_v6, %v379_v7  ;;  %v416_v18 = vcombine.low %v388_v8, %v395_v10  ;;  %v1767_v19 = vcombine.high %v388_v8, %v395_v10 }
 0x23f   : > { %v595_v20 = vrot.slane %v587_v11, %v2404_v33  ;;  %v611_v21 = vrot.slane %v603_v15, %v2404_v33  ;;  %v602_v39 = vrot.slane %v588_v30, %v2404_v33  ;;  %v618_v40 = vrot.slane %v604_v31, %v2404_v33 }
 0x240   : > { %v407_v22 = vrot.slane %v400_v16, %v2402_v26  ;;  %v415_v23 = vrot.slane %v1766_v17, %v2402_v26  ;;  %v423_v24 = vrot.slane %v416_v18, %v2402_v26  ;;  %v431_v25 = vrot.slane %v1767_v19, %v2402_v26 }
 0x241   : > { %v619_v27 = vcombine.low %v595_v20, %v611_v21  ;;  %v620_v38 = vcombine.high %v595_v20, %v611_v21  ;;  %v621_v44 = vcombine.low %v602_v39, %v618_v40  ;;  %v622_v46 = vcombine.high %v602_v39, %v618_v40 }
 0x242   : > { %v432_v28 = vcombine.low %v407_v22, %v415_v23  ;;  %v448_v29 = vcombine.low %v423_v24, %v431_v25  ;;  %v433_v35 = vcombine.high %v407_v22, %v415_v23  ;;  %v449_v36 = vcombine.high %v423_v24, %v431_v25 }
 0x243   : > { %1830 = vmatpush3.xpose.msk.msra.mxu1 %vm771_vm2, %v619_v27 }
 0x244   : > { %1834 = vmatprep.subr.mxu1 %v2155_v1  ;;  %v440_v32 = vrot.slane %v432_v28, %v2404_v33  ;;  %v456_v34 = vrot.slane %v448_v29, %v2404_v33  ;;  %v447_v42 = vrot.slane %v433_v35, %v2404_v33  ;;  %v463_v43 = vrot.slane %v449_v36, %v2404_v33 }
 0x246   : > { %v464_v37 = vcombine.low %v440_v32, %v456_v34  ;;  %v465_v41 = vcombine.high %v440_v32, %v456_v34  ;;  %v466_v45 = vcombine.low %v447_v42, %v463_v43  ;;  %v467_v47 = vcombine.high %v447_v42, %v463_v43 }
 0x248   : > { %1832 = vmatmul.mubr.msk.f32.vlgmr.msra.gmra.mrb[0].mxu1 %vm771_vm2, %v464_v37 }
 0x249   : > { %1835 = vmatpush3.xpose.msk.msra.mxu1 %vm771_vm2, %v620_v38  ;;  %1836 = vmatprep.mubr.msk.f32.mxu1 %vm2154_vm0, %v2155_v1 }
 0x24a   : > { %1839 = vmatprep.subr.mxu1 %v2155_v1 }
 0x24c   : > { %1837 = vmatmul.mubr.msk.f32.vlgmr.msra.gmra.mrb[2].mxu1 %vm771_vm2, %v465_v41 }
 0x24d   : > { %1840 = vmatpush3.xpose.msk.msra.mxu1 %vm771_vm2, %v621_v44  ;;  %1841 = vmatprep.mubr.msk.f32.mxu1 %vm2154_vm0, %v2155_v1 }
 0x24e   : > { %1844 = vmatprep.subr.mxu1 %v2155_v1 }
 0x250   : > { %1842 = vmatmul.mubr.msk.f32.vlgmr.msra.gmra.mrb[4].mxu1 %vm771_vm2, %v466_v45 }
 0x251   : > { %1845 = vmatpush3.xpose.msk.msra.mxu1 %vm771_vm2, %v622_v46  ;;  %1846 = vmatprep.mubr.msk.f32.mxu1 %vm2154_vm0, %v2155_v1 }
 0x252   : > { %1854 = vmatprep.subr.mxu1 %v2155_v1 }
 0x254   : > { %1847 = vmatmul.mubr.msk.f32.vlgmr.msra.gmra.mrb[6].mxu1 %vm771_vm2, %v467_v47 }
 0x255   : > { %1856 = vmatprep.mubr.msk.f32.mxu1 %vm2154_vm0, %v2155_v1 }
 0x31b   : > { %v844_v48 = vpop.f32.mrb[0].mxu1 }
 0x31c   : > { %v1833_v49 = vpop.f32.mrb[1].mxu1  ;;  %v1076_v50 = vsel %vm771_vm2, %v844_v48, -inf }
 0x31d   : > { %1077 = vmax.xlane.f32.xlu0 %v1076_v50 }
 0x31f   : > { %v920_v51 = vpop.f32.mrb[2].mxu1 }
 0x320   : > { %v1838_v52 = vpop.f32.mrb[3].mxu1  ;;  %v1079_v53 = vsel %vm771_vm2, %v920_v51, -inf }
 0x321   : > { %1080 = vmax.xlane.f32.xlu1 %v1079_v53 }
 0x323   : > { %v996_v54 = vpop.f32.mrb[4].mxu1 }
 0x324   : > { %v1843_v55 = vpop.f32.mrb[5].mxu1  ;;  %v1082_v56 = vsel %vm771_vm2, %v996_v54, -inf }
 0x325   : > { %1083 = vmax.xlane.f32.xlu0 %v1082_v56 }
 0x327   : > { %v1072_v57 = vpop.f32.mrb[6].mxu1 }
 0x328   : > { %v1848_v58 = vpop.f32.mrb[7].mxu1  ;;  %v1085_v59 = vsel %vm771_vm2, %v1072_v57, -inf }
 0x329   : > { %1086 = vmax.xlane.f32.xlu0 %v1085_v59 }
 0x332   : > { %623 = vrot.lane.b32.xlu1 %v2386_v9, %s2162_s5 }
 0x3aa   : > { %v1078_v60 = vpop.xlane.xlu0 %1077 }
 0x3ab   : > { %v1088_v61 = vsub.f32 %v844_v48, %v1078_v60 }
 0x3ad   : > { %v1092_v62 = vmul.f32 1.442695, %v1088_v61 }
 0x3ae   : > { %v1081_v63 = vpop.xlane.xlu1 %1080 }
 0x3af   : > { %1974 = vpow2.f32 %v1092_v62  ;;  %v1089_v2 = vsub.f32 %v920_v51, %v1081_v63 }
 0x3b1   : > { %v1094_v3 = vmul.f32 1.442695, %v1089_v2 }
 0x3b2   : > { %v1084_v4 = vpop.xlane.xlu0 %1083  ;;  %v624_v21 = vpop.permute.xlu1 %623 }
 0x3b3   : > { %1976 = vpow2.f32 %v1094_v3  ;;  %v1090_v5 = vsub.f32 %v996_v54, %v1084_v4 }
 0x3b5   : > { %v1096_v6 = vmul.f32 1.442695, %v1090_v5 }
 0x3b6   : > { %v1087_v7 = vpop.xlane.xlu0 %1086 }
 0x3b7   : > { %1978 = vpow2.f32 %v1096_v6  ;;  %v1091_v8 = vsub.f32 %v1072_v57, %v1087_v7 }
 0x3b9   : > { %v2464_v10 = vpop.eup %1974  ;;  %v1098_v11 = vmul.f32 1.442695, %v1091_v8 }
 0x3ba   : > { %v1100_v9 = vsel %vm771_vm2, %v2464_v10, 0.0 }
 0x3bb   : > { %1980 = vpow2.f32 %v1098_v11  ;;  %1101 = vadd.xlane.f32.xlu1 %v1100_v9  ;;  %v1566_v9 = vld [vmem:[#allocation7 + $0x8] sm:$0xff] }
 0x3bd   : > { %v2468_v15 = vpop.eup %1976 }
 0x3be   : > { %v1103_v16 = vsel %vm771_vm2, %v2468_v15, 0.0 }
 0x3bf   : > { %1104 = vadd.xlane.f32.xlu0 %v1103_v16 }
 0x3c1   : > { %v2472_v17 = vpop.eup %1978 }
 0x3c2   : > { %v1106_v18 = vsel %vm771_vm2, %v2472_v17, 0.0 }
 0x3c3   : > { %1107 = vadd.xlane.f32.xlu1 %v1106_v18 }
 0x3c5   : > { %v2476_v19 = vpop.eup %1980 }
 0x3c6   : > { %v1109_v20 = vsel %vm771_vm2, %v2476_v19, 0.0 }
 0x3c7   : > { %1110 = vadd.xlane.f32.xlu0 %v1109_v20 }
 0x3d4   : > { %627 = vrot.lane.b32.xlu1 %v2398_v14, %s2162_s5 }
 0x3d8   : > { %629 = vrot.lane.b32.xlu1 %v2396_v13, %s2162_s5 }
 0x3dd   : > { %625 = vrot.lane.b32.xlu0 %v2393_v12, %s2162_s5 }
 0x448   : > { %v1102_v22 = vpop.xlane.xlu1 %1101 }
 0x449   : > { %1982 = vrcp.f32 %v1102_v22 }
 0x44c   : > { %v1105_v23 = vpop.xlane.xlu0 %1104 }
 0x44d   : > { %1984 = vrcp.f32 %v1105_v23 }
 0x450   : > { %v1108_v24 = vpop.xlane.xlu1 %1107 }
 0x451   : > { %1986 = vrcp.f32 %v1108_v24 }
 0x453   : > { %v1983_v52 = vpop.eup %1982 }
 0x454   : > { %v628_v25 = vpop.permute.xlu1 %627  ;;  %v1111_v27 = vpop.xlane.xlu0 %1110  ;;  %v1116_v4 = vmul.f32 %v1983_v52, %v2464_v10  ;;  %v1565_v10 = vld [vmem:[#allocation7] sm:$0xff] }
 0x455   : > { %v635_v28 = vcombine.low %v624_v21, %v628_v25  ;;  %v636_v29 = vcombine.high %v624_v21, %v628_v25  ;;  %1988 = vrcp.f32 %v1111_v27 }
 0x457   : > { %v643_v14 = vrot.slane %v635_v28, %v2402_v26  ;;  %v650_v13 = vrot.slane %v636_v29, %v2402_v26  ;;  %v1985_v57 = vpop.eup %1984 }
 0x458   : > { %v630_v30 = vpop.permute.xlu1 %629  ;;  %v626_v31 = vpop.permute.xlu0 %625  ;;  %v1117_v5 = vmul.f32 %v1985_v57, %v2468_v15  ;;  %v1887_v15 = vpack.c.bf16 %v1566_v9, %v1565_v10 }
 0x459   : > { %v651_v32 = vcombine.low %v626_v31, %v630_v30  ;;  %v652_v34 = vcombine.high %v626_v31, %v630_v30 }
 0x45b   : > { %v659_v35 = vrot.slane %v651_v32, %v2402_v26  ;;  %v666_v12 = vrot.slane %v652_v34, %v2402_v26  ;;  %v1987_v60 = vpop.eup %1986 }
 0x45c   : > { %v1118_v8 = vmul.f32 %v1987_v60, %v2472_v17 }
 0x45d   : > { %v667_v36 = vcombine.low %v643_v14, %v659_v35  ;;  %v668_v37 = vcombine.high %v643_v14, %v659_v35  ;;  %v683_v38 = vcombine.low %v650_v13, %v666_v12  ;;  %v684_v39 = vcombine.high %v650_v13, %v666_v12  ;;  %v1567_v13 = vld [vmem:[#allocation7 + $0x10] sm:$0xff]  ;;  %v1568_v35 = vld [vmem:[#allocation7 + $0x18] sm:$0xff] }
 0x45f   : > { %v675_v40 = vrot.slane %v667_v36, %v2404_v33  ;;  %v682_v41 = vrot.slane %v668_v37, %v2404_v33  ;;  %v691_v42 = vrot.slane %v683_v38, %v2404_v33  ;;  %v698_v43 = vrot.slane %v684_v39, %v2404_v33  ;;  %v1989_v3 = vpop.eup %1988 }
 0x460   : > { %v1119_v11 = vmul.f32 %v1989_v3, %v2476_v19  ;;  %v1890_v39 = vpack.c.bf16 %v1568_v35, %v1567_v13 }
 0x461   : > { %v703_v44 = vcombine.low %v675_v40, %v682_v41  ;;  %v1770_v45 = vcombine.high %v675_v40, %v682_v41  ;;  %v719_v46 = vcombine.low %v691_v42, %v698_v43  ;;  %v1771_v47 = vcombine.high %v691_v42, %v698_v43 }
 0x463   : > { %v710_v48 = vrot.slane %v703_v44, %v2402_v26  ;;  %v718_v49 = vrot.slane %v1770_v45, %v2402_v26  ;;  %v726_v50 = vrot.slane %v719_v46, %v2402_v26  ;;  %v734_v51 = vrot.slane %v1771_v47, %v2402_v26 }
 0x465   : > { %v735_v53 = vcombine.low %v710_v48, %v718_v49  ;;  %v751_v54 = vcombine.low %v726_v50, %v734_v51  ;;  %v736_v55 = vcombine.high %v710_v48, %v718_v49  ;;  %v752_v56 = vcombine.high %v726_v50, %v734_v51 }
 0x467   : > { %v743_v58 = vrot.slane %v735_v53, %v2404_v33  ;;  %v759_v59 = vrot.slane %v751_v54, %v2404_v33  ;;  %v750_v61 = vrot.slane %v736_v55, %v2404_v33  ;;  %v766_v62 = vrot.slane %v752_v56, %v2404_v33 }
 0x469   : > { %v767_v63 = vcombine.low %v743_v58, %v759_v59  ;;  %v768_v2 = vcombine.high %v743_v58, %v759_v59  ;;  %v769_v6 = vcombine.low %v750_v61, %v766_v62  ;;  %v770_v7 = vcombine.high %v750_v61, %v766_v62 }
 0x46b   : > { %1850 = vmatpush3.msra.mxu0 %v767_v63  ;;  %1855 = vmatpush3.msra.mxu1 %v768_v2  ;;  %v1786_v2 = vld [vmem:[%s2595_s3] ss:$0 sm:$0xff] }
 0x46c   : > { %1852 = vmatmul.mubr.msk.f32.vlgmr.msra.gmra.mrb[2].mxu0 %vm771_vm2, %v1116_v4  ;;  %1857 = vmatmul.mubr.msk.f32.vlgmr.msra.gmra.mrb[8].mxu1 %vm771_vm2, %v1117_v5 }
 0x46d   : > { %1859 = vmatprep.subr.mxu0 %v2155_v1  ;;  %1864 = vmatprep.subr.mxu1 %v2155_v1 }
 0x46e   : > { %1860 = vmatpush3.msra.mxu0 %v769_v6  ;;  %1865 = vmatpush3.msra.mxu1 %v770_v7 }
 0x46f   : > { %1861 = vmatprep.mubr.msk.f32.mxu0 %vm2154_vm0, %v2155_v1  ;;  %1866 = vmatprep.mubr.msk.f32.mxu1 %vm2154_vm0, %v2155_v1 }
 0x470   : > { %1862 = vmatmul.mubr.msk.f32.vlgmr.msra.gmra.mrb[4].mxu0 %vm771_vm2, %v1118_v8  ;;  %1867 = vmatmul.mubr.msk.f32.vlgmr.msra.gmra.mrb[10].mxu1 %vm771_vm2, %v1119_v11 }
 0x471   : > { %1886 = vmatprep.subr.bf16.mxu0 %v2153_v0  ;;  %1877 = vmatprep.mubr.msk.f32.mxu0 %vm2154_vm0, %v2155_v1 }
 0x472   : > { %1888 = vmatpush3.bf16.msra.mxu0 %v1887_v15 }
 0x473   : > { %1889 = vmatprep.subr.bf16.mxu0 %v2153_v0 }
 0x476   : > { %1891 = vmatpush3.bf16.msra.mxu0 %v1890_v39 }
 0x53f   : > { %v1189_v16 = vpop.f32.mrb[2].mxu0  ;;  %v1262_v17 = vpop.f32.mrb[8].mxu1 }
 0x540   : > { %v1853_v18 = vpop.f32.mrb[3].mxu0  ;;  %v1858_v19 = vpop.f32.mrb[9].mxu1 }
 0x543   : > { %v1335_v20 = vpop.f32.mrb[4].mxu0  ;;  %v1408_v21 = vpop.f32.mrb[10].mxu1 }
 0x544   : > { %v1412_v22 = vcombine.low %v1189_v16, %v1335_v20  ;;  %v1413_v23 = vcombine.high %v1189_v16, %v1335_v20  ;;  %v1428_v24 = vcombine.low %v1262_v17, %v1408_v21  ;;  %v1429_v25 = vcombine.high %v1262_v17, %v1408_v21  ;;  %v1863_v27 = vpop.f32.mrb[5].mxu0  ;;  %v1868_v28 = vpop.f32.mrb[11].mxu1 }
 0x546   : > { %v1420_v1 = vrot.slane %v1412_v22, %v2402_v26  ;;  %v1427_v29 = vrot.slane %v1413_v23, %v2402_v26  ;;  %v1436_v30 = vrot.slane %v1428_v24, %v2402_v26  ;;  %v1443_v0 = vrot.slane %v1429_v25, %v2402_v26 }
 0x548   : > { %v1444_v31 = vcombine.low %v1420_v1, %v1436_v30  ;;  %v1445_v32 = vcombine.high %v1420_v1, %v1436_v30  ;;  %v1460_v34 = vcombine.low %v1427_v29, %v1443_v0  ;;  %v1461_v14 = vcombine.high %v1427_v29, %v1443_v0 }
 0x54a   : > { %v1452_v12 = vrot.slane %v1444_v31, %v2404_v33  ;;  %v1459_v36 = vrot.slane %v1445_v32, %v2404_v33  ;;  %v1468_v37 = vrot.slane %v1460_v34, %v2404_v33  ;;  %v1475_v38 = vrot.slane %v1461_v14, %v2404_v33 }
 0x54c   : > { %v1480_v40 = vcombine.low %v1452_v12, %v1459_v36  ;;  %v1784_v41 = vcombine.high %v1452_v12, %v1459_v36  ;;  %v1496_v42 = vcombine.low %v1468_v37, %v1475_v38  ;;  %v1785_v43 = vcombine.high %v1468_v37, %v1475_v38 }
 0x54e   : > { %v1487_v44 = vrot.slane %v1480_v40, %v2402_v26  ;;  %v1495_v45 = vrot.slane %v1784_v41, %v2402_v26  ;;  %v1503_v46 = vrot.slane %v1496_v42, %v2402_v26  ;;  %v1511_v47 = vrot.slane %v1785_v43, %v2402_v26 }
 0x550   : > { %v1513_v48 = vcombine.high %v1487_v44, %v1495_v45  ;;  %v1529_v49 = vcombine.high %v1503_v46, %v1511_v47  ;;  %v1512_v50 = vcombine.low %v1487_v44, %v1495_v45  ;;  %v1528_v51 = vcombine.low %v1503_v46, %v1511_v47 }
 0x552   : > { %v1527_v52 = vrot.slane %v1513_v48, %v2404_v33  ;;  %v1543_v53 = vrot.slane %v1529_v49, %v2404_v33  ;;  %v1520_v54 = vrot.slane %v1512_v50, %v2404_v33  ;;  %v1536_v55 = vrot.slane %v1528_v51, %v2404_v33 }
 0x554   : > { %v1546_v56 = vcombine.low %v1527_v52, %v1543_v53  ;;  %v1545_v57 = vcombine.high %v1520_v54, %v1536_v55  ;;  %v1547_v58 = vcombine.high %v1527_v52, %v1543_v53  ;;  %v1544_v59 = vcombine.low %v1520_v54, %v1536_v55 }
 0x556   : > { %1553 = vrot.lane.b32.xlu1 %v1546_v56, %s2163_s6  ;;  %1549 = vrot.lane.b32.xlu0 %v1545_v57, %s2164_s26 }
 0x55a   : > { %1557 = vrot.lane.b32.xlu0 %v1547_v58, %s2165_s10 }
 0x5c8   : > { %v1550_v26 = vpop.permute.xlu0 %1549  ;;  %v1554_v60 = vpop.permute.xlu1 %1553 }
 0x5c9   : > { %v1560_v61 = vsel %vm771_vm2, %v1544_v59, %v1550_v26 }
 0x5ca   : > { %v1562_v62 = vsel %vm1561_vm3, %v1560_v61, %v1554_v60 }
 0x5cc   : > { %v1558_v33 = vpop.permute.xlu0 %1557 }
 0x5cd   : > { %v1564_v63 = vsel %vm1563_vm4, %v1562_v62, %v1558_v33 }
 0x5ce   : > { %1878 = vmatmul.mubr.msk.f32.vlgmr.msra.gmra.mrb[6].mxu0 %vm247_vm1, %v1564_v63 }
 0x6a1   : > { %v1645_v3 = vpop.f32.mrb[6].mxu0 }
 0x6a2   : > { %v1646_v4 = vadd.f32 %v1786_v2, %v1645_v3  ;;  %v1879_v5 = vpop.f32.mrb[7].mxu0 }
 0x6a4   : > { %1649 = vst.msk [vmem:[%s241_s11] sm:$0xff] %vm247_vm1, %v1646_v4 }
 0x6a5   : > { %2089 = shalt.err (!%p2086_p2)
}
 0x6a6   : > { %s2090_s29 = scalar_lea.hbm %s2547_s21, 128  ;;  %s2094_s26 = scalar_lea.hbm %s2596_s4, 256 }
 0x6a7   : > { %p2091_p13 = scmp.ne.s32.totalorder %s2547_s21, %s2090_s29  ;;  %p2095_p4 = scmp.lt.u32.totalorder %s2547_s21, %s2596_s4 }
 0x6a8   : > { %p2096_p5 = scmp.lt.u32.totalorder %s2094_s26, %s2090_s29  ;;  %p2098_p11 = scmp.lt.u32.totalorder %s2090_s29, %s2547_s21 }
 0x6a9   : > { %p2092_p6 = pnand %p2091_p13, %p2610_p0 }
 0x6aa   : > { %p2097_p8 = por %p2096_p5, %p2095_p4 }
 0x6ab   : > { %p2093_p10 = pneg %p2092_p6 }
 0x6ac   : > { %p2099_p1 = por %p2098_p11, %p2097_p8 }
 0x6ae   : > { %p2100_p3 = pnand %p2099_p1, %p2093_p10 }
 0x6b0   : > { %2103 = shalt.err (!%p2100_p3)
}
 0x6b1   : > { %1902 = dma.vmem_to_hbm [thread:$0]  (%p2610_p0), %s2549_s12, 128, %s2547_s21, %s1651_s23  }
 0x6b2 PF: > { %s1676_s20 = sand.u32 1, %s2134_s15   ;;  %p2611_p7 = scmp.ne.s32.totalorder %s2601_s22, 0 }
 0x6b3   : > { %p2612_p9 = scmp.ge.s32.totalorder %s2146_s18, 2  ;;  %s1677_s28 = scalar_lea.sflag [#allocation4], %s1676_s20 }
 0x6b5   : > { %p1916_p12 = pnand %p2612_p9, %p2611_p7 }
 0x6b7   : > { %2129 = dma.done.wait (!%p1916_p12), %s1677_s28, 128  }
 0x6b8   : > { %2131 = vsyncadd (!%p1916_p12), %s1677_s28, 4294967168  ;;  %p18_p2 = scmp.ge.s32.totalorder %s2302_s9, 4   ;;  %s2613_s15 = smov %s2138_s16 }
 0x6b9   : > { %s2614_s16 = smov %s2142_s17  ;;  %s2615_s17 = smov %s2318_s14 }
 0x6ba   : > { %s2616_s18 = smov %s2302_s9  ;;  %20 = sbr.rel (!%p18_p2) target bundleno = 6 (0x6), region = 89 }
 0x6c1   :  { %1682 = vsyncpa [#allocation3], 1 }
 0x6c2   :  { %1684 = vsyncpa [#allocation3 + $0x1], 1 }
 0x6c3   :  { %1685 = vsyncpa [#allocation6], 1 }
 0x6c4   :  { %1686 = vsyncpa [#allocation4], 1 }
 0x6c5   :  { %1688 = vsyncpa [#allocation4 + $0x1], 1 }

</bundles_post_ra>
